<compile_context>
chip_gen: v6e
topology: v6e:2x2x1
jax: 0.10.0
libtpu: 0.0.40
codegen_flags: <defaults>
</compile_context>

<pallas_src>
import functools

import jax
import jax.numpy as jnp
from jax.experimental import pallas as pl
from jax.experimental.pallas import tpu as pltpu


# --------------------------------------------------------------------------- #
# Kernels
# --------------------------------------------------------------------------- #
def _layernorm_nobias_kernel(x_ref, w_ref, o_ref, *, eps, h_valid):
    """x_ref: (TM, Hp) tile of rows; w_ref: (1, Hp) f32 weight; o_ref: (TM, Hp)."""
    x = x_ref[...].astype(jnp.float32)
    hp = x.shape[-1]
    inv_h = jnp.float32(1.0 / h_valid)

    # Two-pass statistics (mean, then centered variance) for numerical safety.
    mean = jnp.sum(x, axis=-1, keepdims=True) * inv_h
    xc = x - mean
    if h_valid != hp:
        # Feature axis was zero-padded to a lane-dense width: zero the pad
        # lanes of the *centered* values so they don't bias the variance.
        lane = jax.lax.broadcasted_iota(jnp.int32, x.shape, x.ndim - 1)
        xc = jnp.where(lane < h_valid, xc, 0.0)
    var = jnp.sum(xc * xc, axis=-1, keepdims=True) * inv_h
    inv = jax.lax.rsqrt(var + jnp.float32(eps))

    o_ref[...] = (xc * inv * w_ref[...]).astype(o_ref.dtype)


def _layernorm_nobias_wide_kernel(x_ref, w_ref, o_ref, s1_ref, s2_ref, *,
                                  eps, h_valid):
    """Fallback for very wide H: grid = (row_tiles, 2 phases, h_chunks).

    Phase 0 accumulates per-row sum / sum-of-squares over feature chunks into
    VMEM scratch; phase 1 re-reads the chunks and writes the normalized output.
    Uses the (padding-safe) E[x^2]-mean^2 form; input is read twice by design.
    """
    p = pl.program_id(1)   # 0: accumulate stats, 1: normalize
    j = pl.program_id(2)   # feature-chunk index

    @pl.when(jnp.logical_and(p == 0, j == 0))
    def _():
        s1_ref[...] = jnp.zeros_like(s1_ref)
        s2_ref[...] = jnp.zeros_like(s2_ref)

    x = x_ref[...].astype(jnp.float32)

    @pl.when(p == 0)
    def _():
        s1_ref[...] += jnp.sum(x, axis=-1, keepdims=True)
        s2_ref[...] += jnp.sum(x * x, axis=-1, keepdims=True)
        # Placeholder write (overwritten in phase 1); avoids flushing
        # uninitialized VMEM to HBM under debug / NaN-checking modes.
        o_ref[...] = jnp.zeros_like(o_ref)

    @pl.when(p == 1)
    def _():
        inv_h = jnp.float32(1.0 / h_valid)
        mean = s1_ref[...] * inv_h
        var = jnp.maximum(s2_ref[...] * inv_h - mean * mean, 0.0)
        inv = jax.lax.rsqrt(var + jnp.float32(eps))
        o_ref[...] = ((x - mean) * inv * w_ref[...]).astype(o_ref.dtype)


# --------------------------------------------------------------------------- #
# Tiling heuristics
# --------------------------------------------------------------------------- #
def _vmem_capacity_bytes():
    """Physical VMEM per TensorCore; conservative fallback if the query fails."""
    try:
        info = pltpu.get_tpu_info()
        cap = getattr(info, "vmem_capacity_bytes", None)
        if cap:
            return int(cap)
    except Exception:
        pass
    return 64 * 1024 * 1024  # v7x-sized fallback (smallest of v5e/v6e/v7x)


def _pick_tm(rows, hp, itemsize, vmem_cap, packing):
    """Row-tile size. Returns None if even a minimal row tile blows VMEM."""
    if rows <= packing:
        return rows  # single full-extent block (allowed: equals array dims)

    def r_up(v):
        return max(packing, ((v + packing - 1) // packing) * packing)

    # VMEM ceiling: 2x double-buffered input + 2x double-buffered output tiles
    # (at the I/O itemsize) plus ~3 f32-sized per-row temporaries (x upcast,
    # centered x, f32 result before downcast). Use half of physical VMEM so
    # the 64 MiB v7x part keeps >= ~16 MiB of headroom (no spill regressions).
    bytes_per_row = hp * (4 * itemsize + 3 * 4)
    usable = vmem_cap // 2
    tm_vmem = (usable // bytes_per_row) // packing * packing
    if tm_vmem < packing:
        return None  # extremely wide H -> feature-chunked fallback

    # Pipeline-depth target: >= ~8 grid steps (>= 2 per TensorCore on v7x and
    # enough depth for the double-buffer pipeline to hide DMA latency).
    target_steps = 8
    tm_steps = r_up(pl.cdiv(rows, target_steps))
    # Efficiency floor / cap: keep input tiles roughly in the 2-16 MiB range
    # (per-step overhead ~0.35 us; measured ~85% of roofline from ~1-4 MiB up).
    tm_floor = r_up(pl.cdiv(2 << 20, hp * itemsize))
    tm_cap = max(packing, ((16 << 20) // (hp * itemsize)) // packing * packing)

    tm = min(tm_vmem, tm_cap, max(tm_steps, tm_floor))
    tm = min(tm, r_up(rows))
    return max(tm, packing)


# --------------------------------------------------------------------------- #
# Wrapper
# --------------------------------------------------------------------------- #
def layer_norm_no_bias(x, weight, eps=1e-5):
    """x: (..., H), weight: (H,). Returns same shape/dtype as x."""
    orig_shape = x.shape
    H = orig_shape[-1]
    assert weight.shape == (H,)

    x2 = x.reshape(-1, H)
    rows = x2.shape[0]
    if rows == 0:
        return x  # empty batch: nothing to normalize

    itemsize = jnp.dtype(x.dtype).itemsize
    # Sublane packing of the I/O dtype: 8 for f32, 16 for bf16, 32 for int8/fp8.
    packing = max(8, 32 // max(1, itemsize))

    # Lane-dense layout: pad the feature axis to a multiple of 128 so stores
    # are unmasked full-lane vst (the single biggest lever for this op).
    Hp = ((H + 127) // 128) * 128
    if Hp != H:
        x2 = jnp.pad(x2, ((0, 0), (0, Hp - H)))
        w2 = jnp.pad(weight.astype(jnp.float32), (0, Hp - H)).reshape(1, Hp)
    else:
        w2 = weight.astype(jnp.float32).reshape(1, Hp)

    vmem_cap = _vmem_capacity_bytes()
    vmem_limit = vmem_cap * 3 // 4  # ~96 MiB on v5e/v6e, ~48 MiB on v7x
    tm = _pick_tm(rows, Hp, itemsize, vmem_cap, packing)

    if tm is not None:
        # -------- main path: one pass, rows tiled along a parallel grid -----
        grid = (pl.cdiv(rows, tm),)  # ragged last block; no pad/slice copies
        out = pl.pallas_call(
            functools.partial(_layernorm_nobias_kernel, eps=eps, h_valid=H),
            out_shape=jax.ShapeDtypeStruct((rows, Hp), x.dtype),
            grid_spec=pltpu.PrefetchScalarGridSpec(
                num_scalar_prefetch=0,
                grid=grid,
                in_specs=[
                    pl.BlockSpec((tm, Hp), lambda i: (i, 0)),
                    # Constant block index -> weight DMA'd once, VMEM-resident.
                    pl.BlockSpec((1, Hp), lambda i: (0, 0)),
                ],
                out_specs=pl.BlockSpec((tm, Hp), lambda i: (i, 0)),
            ),
            compiler_params=pltpu.CompilerParams(
                dimension_semantics=("parallel",),
                vmem_limit_bytes=vmem_limit,
            ),
        )(x2, w2)
    else:
        # -------- fallback path: feature-chunked two-phase kernel -----------
        usable = vmem_cap // 2
        bytes_per_elem = 4 * itemsize + 8  # dbuf in + dbuf out + f32 temps
        tn = max(128, min(Hp, (usable // (256 * bytes_per_elem)) // 128 * 128))
        tm_w = max(packing, (usable // (tn * bytes_per_elem)) // packing * packing)
        tm_w = min(tm_w, max(packing,
                             ((rows + packing - 1) // packing) * packing))
        grid = (pl.cdiv(rows, tm_w), 2, pl.cdiv(Hp, tn))
        out = pl.pallas_call(
            functools.partial(_layernorm_nobias_wide_kernel, eps=eps, h_valid=H),
            out_shape=jax.ShapeDtypeStruct((rows, Hp), x.dtype),
            grid_spec=pltpu.PrefetchScalarGridSpec(
                num_scalar_prefetch=0,
                grid=grid,
                in_specs=[
                    pl.BlockSpec((tm_w, tn), lambda i, p, j: (i, j)),
                    pl.BlockSpec((1, tn), lambda i, p, j: (0, j)),
                ],
                out_specs=pl.BlockSpec((tm_w, tn), lambda i, p, j: (i, j)),
                scratch_shapes=[
                    pltpu.VMEM((tm_w, 1), jnp.float32),  # per-row sum(x)
                    pltpu.VMEM((tm_w, 1), jnp.float32),  # per-row sum(x*x)
                ],
            ),
            compiler_params=pltpu.CompilerParams(
                dimension_semantics=("parallel", "arbitrary", "arbitrary"),
                vmem_limit_bytes=vmem_limit,
            ),
        )(x2, w2)

    if Hp != H:
        out = out[:, :H]
    return out.reshape(orig_shape)


# --------------------------------------------------------------------------- #
# Self-test
# --------------------------------------------------------------------------- #
if __name__ == "__main__":
    key = jax.random.PRNGKey(0)
    k_x1, k_w1, k_x2, k_w2 = jax.random.split(key, 4)

    def ref_ln(x, w, eps=1e-5):
        xf = x.astype(jnp.float32)
        mean = jnp.mean(xf, axis=-1, keepdims=True)
        var = jnp.mean((xf - mean) ** 2, axis=-1, keepdims=True)
        return ((xf - mean) * jax.lax.rsqrt(var + eps)
                * w.astype(jnp.float32)).astype(x.dtype)

    # Case 1: lane-dense hidden (multiple of 128); nonzero mean exercises the
    # two-pass statistics.
    batch, seq, hidden = 2, 8, 128
    x1 = jax.random.normal(k_x1, (batch, seq, hidden), dtype=jnp.float32) + 3.0
    w1 = jax.random.normal(k_w1, (hidden,), dtype=jnp.float32)
    y1 = jax.block_until_ready(layer_norm_no_bias(x1, w1, eps=1e-5))
    assert jnp.allclose(y1, ref_ln(x1, w1), atol=2e-5, rtol=2e-5), \
        "mismatch vs reference (H % 128 == 0 path)"

    # Case 2: hidden not a multiple of 128 -> wrapper pads the feature axis to
    # a lane-dense width and slices the result back.
    hidden2 = 96
    x2 = jax.random.normal(k_x2, (batch, seq, hidden2), dtype=jnp.float32)
    w2 = jax.random.normal(k_w2, (hidden2,), dtype=jnp.float32)
    y2 = jax.block_until_ready(layer_norm_no_bias(x2, w2, eps=1e-5))
    assert jnp.allclose(y2, ref_ln(x2, w2), atol=2e-5, rtol=2e-5), \
        "mismatch vs reference (padded-H path)"

    print("KERNEL_OK")
</pallas_src>

<mosaic_0001>
module attributes {stable_mosaic.version = 11 : i64} {
  func.func @_layernorm_nobias_kernel(%arg0: i32, %arg1: memref<16x128xf32, #tpu.memory_space<vmem>>, %arg2: memref<1x128xf32, #tpu.memory_space<vmem>>, %arg3: memref<16x128xf32, #tpu.memory_space<vmem>>) attributes {dimension_semantics = [#tpu.dimension_semantics<parallel>], iteration_bounds = array<i64: 1>, scalar_prefetch = 0 : i64, scratch_operands = 0 : i64, tpu.core_type = #tpu.core_type<tc>, window_params = [{transform_indices = @transform_0, window_bounds = array<i64: 16, 128>}, {pipeline_mode = #tpu.pipeline_mode<synchronous>, transform_indices = @transform_1, window_bounds = array<i64: 1, 128>}, {transform_indices = @transform_2, window_bounds = array<i64: 16, 128>}]} {
    %c0 = arith.constant 0 : index
    %c0_0 = arith.constant 0 : index
    %0 = vector.load %arg1[%c0, %c0_0] : memref<16x128xf32, #tpu.memory_space<vmem>>, vector<16x128xf32>
    %cst = arith.constant dense<0.000000e+00> : vector<16xf32>
    %1 = vector.multi_reduction <add>, %0, %cst [1] : vector<16x128xf32> to vector<16xf32>
    %2 = vector.shape_cast %1 : vector<16xf32> to vector<16x1xf32>
    %cst_1 = arith.constant 7.812500e-03 : f32
    %3 = vector.broadcast %cst_1 : f32 to vector<16x1xf32>
    %4 = arith.mulf %2, %3 : vector<16x1xf32>
    %5 = vector.broadcast %4 : vector<16x1xf32> to vector<16x128xf32>
    %6 = arith.subf %0, %5 : vector<16x128xf32>
    %7 = arith.mulf %6, %6 : vector<16x128xf32>
    %cst_2 = arith.constant dense<0.000000e+00> : vector<16xf32>
    %8 = vector.multi_reduction <add>, %7, %cst_2 [1] : vector<16x128xf32> to vector<16xf32>
    %9 = vector.shape_cast %8 : vector<16xf32> to vector<16x1xf32>
    %cst_3 = arith.constant 7.812500e-03 : f32
    %10 = vector.broadcast %cst_3 : f32 to vector<16x1xf32>
    %11 = arith.mulf %9, %10 : vector<16x1xf32>
    %cst_4 = arith.constant 9.99999974E-6 : f32
    %12 = vector.broadcast %cst_4 : f32 to vector<16x1xf32>
    %13 = arith.addf %11, %12 : vector<16x1xf32>
    %14 = math.rsqrt %13 : vector<16x1xf32>
    %15 = vector.broadcast %14 : vector<16x1xf32> to vector<16x128xf32>
    %16 = arith.mulf %6, %15 : vector<16x128xf32>
    %c0_5 = arith.constant 0 : index
    %c0_6 = arith.constant 0 : index
    %17 = vector.load %arg2[%c0_5, %c0_6] : memref<1x128xf32, #tpu.memory_space<vmem>>, vector<1x128xf32>
    %18 = vector.broadcast %17 : vector<1x128xf32> to vector<16x128xf32>
    %19 = arith.mulf %16, %18 : vector<16x128xf32>
    %c0_7 = arith.constant 0 : index
    %c0_8 = arith.constant 0 : index
    %20 = vector.load %arg3[%c0_7, %c0_8] : memref<16x128xf32, #tpu.memory_space<vmem>>, vector<16x128xf32>
    tpu.vector_store %arg3[%c0_7, %c0_8], %19 {strides = array<i32>} : memref<16x128xf32, #tpu.memory_space<vmem>>, vector<16x128xf32>,
    return
  }
  func.func @transform_0(%arg0: i32) -> (i32, i32) {
    %c0_i32 = arith.constant 0 : i32
    %c0_i32_0 = arith.constant 0 : i32
    return %arg0, %c0_i32 : i32, i32
  }
  func.func @transform_1(%arg0: i32) -> (i32, i32) {
    %c0_i32 = arith.constant 0 : i32
    %c0_i32_0 = arith.constant 0 : i32
    %c0_i32_1 = arith.constant 0 : i32
    return %c0_i32, %c0_i32_0 : i32, i32
  }
  func.func @transform_2(%arg0: i32) -> (i32, i32) {
    %c0_i32 = arith.constant 0 : i32
    %c0_i32_0 = arith.constant 0 : i32
    return %arg0, %c0_i32 : i32, i32
  }
}

</mosaic_0001>

<bundles_post_ra>
// kernel: tpu_custom_call.1
= control target key start
LH: loop header
LB: loop body
LE: loop exit
PB: predicated region body
PF: predicated region fallthrough
CT: control target
= control target key end

     0   :  { %7 = vsyncpa [#allocation3], 0  ;;  %s165_s0 = inlined_call_operand.hbm [shape: f32[16,128], index: 0, kind: input, shape index: {}]   ;;  %s166_s1 = inlined_call_operand.vmem [shape: f32[1,128], index: 1, kind: input, shape index: {}]   ;;  %s167_s2 = inlined_call_operand.hbm [shape: f32[16,128], index: 2, kind: output, shape index: {}]  }
   0x1   :  { %8 = vsyncpa [#allocation4], 0  ;;  %s131_s9 = smov [#allocation2]  }
   0x2   :  { %s14_s10 = sshll.u32 %s131_s9, 4  ;;  %s15_s10 = int_to_ptr.vmem [resolvable:$true] %s14_s10 }
   0x3   :  { %s95_s11 = scalar_lea.vmem %s15_s10, 256  ;;  %p100_p1 = scmp.lt.s32.totalorder %s15_s10, %s15_s10 }
   0x4   :  { %p96_p0 = scmp.ne.s32.totalorder %s15_s10, %s95_s11  ;;  %p101_p2 = scmp.lt.s32.totalorder %s95_s11, %s95_s11 }
   0x6   :  { %p102_p3 = por %p101_p2, %p100_p1 }
   0x8   :  { %p103_p4 = pnand %p102_p3, %p96_p0 }
   0xa   :  { %106 = shalt.err (!%p103_p4)
}
   0xb   :  { %s132_s12 = smov 128   ;;  %s133_s13 = smov 8  }
   0xc   :  { %20 = dma.hbm_to_vmem [thread:$0]  %s165_s0, 256, %s15_s10, [#allocation3], %s132_s12, %s132_s12, %s133_s13  }
   0xd   :  { %127 = dma.done.wait [#allocation3], 256  }
   0xe   :  { %128 = vsyncadd [#allocation3], 4294967040  ;;  %v26_v0 = vld [vmem:[#allocation2] sm:$0xff]  ;;  %v27_v1 = vld [vmem:[#allocation2 + $0x8] sm:$0xff]  ;;  %s134_s17 = smov [#allocation5]  }
   0xf   :  { %28 = vadd.xlane.f32.xlu0 %v26_v0  ;;  %v78_v17 = vld [vmem:[%s166_s1] ss:$0 sm:$0xff]  ;;  %s66_s18 = sshll.u32 %s134_s17, 4  ;;  %s67_s18 = int_to_ptr.vmem [resolvable:$true] %s66_s18 }
  0x10   :  { %s107_s19 = scalar_lea.vmem %s67_s18, 256  ;;  %p112_p6 = scmp.lt.s32.totalorder %s67_s18, %s67_s18 }
  0x11   :  { %p108_p5 = scmp.ne.s32.totalorder %s67_s18, %s107_s19  ;;  %p113_p7 = scmp.lt.s32.totalorder %s107_s19, %s107_s19 }
  0x13   :  { %30 = vadd.xlane.f32.xlu0 %v27_v1  ;;  %p114_p8 = por %p113_p7, %p112_p6 }
  0x15   :  { %p115_p9 = pnand %p114_p8, %p108_p5 }
  0x98   :  { %v29_v2 = vpop.xlane.xlu0 %28 }
  0x99   :  { %v32_v3 = vmul.f32 0.0078125, %v29_v2 }
  0x9b   :  { %v34_v4 = vsub.f32 %v26_v0, %v32_v3 }
  0x9c   :  { %v31_v5 = vpop.xlane.xlu0 %30 }
  0x9d   :  { %v33_v6 = vmul.f32 0.0078125, %v31_v5  ;;  %v36_v7 = vmul.f32 %v34_v4, %v34_v4 }
  0x9f   :  { %v35_v8 = vsub.f32 %v27_v1, %v33_v6  ;;  %38 = vadd.xlane.f32.xlu1 %v36_v7 }
  0xa1   :  { %v37_v9 = vmul.f32 %v35_v8, %v35_v8 }
  0xa3   :  { %40 = vadd.xlane.f32.xlu1 %v37_v9 }
 0x128   :  { %v39_v10 = vpop.xlane.xlu1 %38 }
 0x129   :  { %v42_v11 = vmul.f32 0.0078125, %v39_v10 }
 0x12b   :  { %v44_v12 = vadd.f32 1e-05, %v42_v11 }
 0x12c   :  { %v41_v13 = vpop.xlane.xlu1 %40 }
 0x12d   :  { %83 = vrsqrt.f32 %v44_v12  ;;  %v43_v14 = vmul.f32 0.0078125, %v41_v13 }
 0x12f   :  { %v45_v15 = vadd.f32 1e-05, %v43_v14 }
 0x131   :  { %85 = vrsqrt.f32 %v45_v15 }
 0x13a   :  { %v84_v16 = vpop.eup %83 }
 0x13b   :  { %v48_v18 = vmul.f32 %v84_v16, %v34_v4 }
 0x13d   :  { %v57_v19 = vmul.f32 %v78_v17, %v48_v18 }
 0x13e   :  { %v86_v20 = vpop.eup %85 }
 0x13f   :  { %v49_v21 = vmul.f32 %v86_v20, %v35_v8  ;;  %59 = vst [vmem:[#allocation5] sm:$0xff] %v57_v19 }
 0x141   :  { %v58_v22 = vmul.f32 %v78_v17, %v49_v21 }
 0x143   :  { %60 = vst [vmem:[#allocation5 + $0x8] sm:$0xff] %v58_v22 }
 0x144   :  { %118 = shalt.err (!%p115_p9)
}
 0x145   :  { %72 = dma.vmem_to_hbm [thread:$0]  %s67_s18, 256, %s167_s2, [#allocation4], %s132_s12, %s132_s12, %s133_s13  }
 0x146   :  { %129 = dma.done.wait [#allocation4], 256  }
 0x147   :  { %130 = vsyncadd [#allocation4], 4294967040 }
 0x148   :  { %76 = vsyncpa [#allocation3], 1 }
 0x149   :  { %77 = vsyncpa [#allocation4], 1 }

</bundles_post_ra>
